<compile_context>
chip_gen: v7x
topology: tpu7x:2x2x1
jax: 0.10.0
libtpu: 0.0.40
codegen_flags: <defaults>
</compile_context>

<pallas_src>
import functools
import math

import jax
import jax.numpy as jnp
from jax.experimental import pallas as pl
from jax.experimental.pallas import tpu as pltpu

LANE = 128
_VMEM_LIMIT = 32 * 1024 * 1024


def _rup(n, m):
    return (n + m - 1) // m * m


def _pad_to(a, rows=None, cols=None):
    r = a.shape[0] if rows is None else rows
    c = a.shape[1] if cols is None else cols
    return jnp.pad(a, ((0, r - a.shape[0]), (0, c - a.shape[1])))


# ------------------------------------------------------------------ kernels

def _mm_stats_body(x_ref, w_ref, b_ref, y_ref, stats_ref, m_valid, block_m, masked):
    # x_ref: (bm, Kp); w_ref: (Kp, OCp); b_ref: (1, OCp) or None
    acc = jnp.dot(x_ref[...], w_ref[...], preferred_element_type=jnp.float32)
    if b_ref is not None:
        acc = acc + b_ref[...]
    y_ref[...] = acc

    # single-pass per-channel partial stats for BatchNorm (sum, sum of squares),
    # masked so zero-padded rows do not pollute the batch statistics.
    if masked:
        row = pl.program_id(0) * block_m + jax.lax.broadcasted_iota(
            jnp.int32, acc.shape, 0)
        acc_s = jnp.where(row < m_valid, acc, 0.0)
    else:
        acc_s = acc
    ssum = jnp.sum(acc_s, axis=0, keepdims=True)            # (1, OCp)
    ssq = jnp.sum(acc_s * acc_s, axis=0, keepdims=True)     # (1, OCp)
    rid = jax.lax.broadcasted_iota(jnp.int32, (8, acc.shape[1]), 0)
    stats_ref[...] = jnp.where(rid == 0, ssum, 0.0) + jnp.where(rid == 1, ssq, 0.0)


def _mm_stats_kernel(x_ref, w_ref, y_ref, stats_ref, *, m_valid, block_m, masked):
    _mm_stats_body(x_ref, w_ref, None, y_ref, stats_ref, m_valid, block_m, masked)


def _mm_bias_stats_kernel(x_ref, w_ref, b_ref, y_ref, stats_ref, *, m_valid,
                          block_m, masked):
    _mm_stats_body(x_ref, w_ref, b_ref, y_ref, stats_ref, m_valid, block_m, masked)


def _scale_shift_relu_kernel(x_ref, s_ref, t_ref, o_ref):
    y = x_ref[...] * s_ref[...] + t_ref[...]
    o_ref[...] = jnp.maximum(y, 0.0).astype(o_ref.dtype)


def _bn_add_relu_kernel(a_ref, r_ref, sa_ref, ta_ref, sr_ref, tr_ref, o_ref):
    a = a_ref[...] * sa_ref[...] + ta_ref[...]
    r = r_ref[...].astype(jnp.float32) * sr_ref[...] + tr_ref[...]
    o_ref[...] = jnp.maximum(a + r, 0.0)


# ------------------------------------------------------------------ wrappers

def conv_matmul_stats(x2d, w2d, bias=None, *, m_valid, block_m=512):
    """(M,Kp)@(Kp,OCp) tiled matmul (+bias), f32 output + per-tile BN partials."""
    M, Kp = x2d.shape
    Kw, OCp = w2d.shape
    assert Kw == Kp and Kp % LANE == 0 and OCp % LANE == 0
    bm = min(block_m, _rup(M, 8))
    Mp = _rup(M, bm)
    if Mp != M:
        x2d = jnp.pad(x2d, ((0, Mp - M), (0, 0)))
    nt = Mp // bm
    masked = Mp != m_valid

    x_spec = pl.BlockSpec((bm, Kp), lambda i: (i, 0))
    w_spec = pl.BlockSpec((Kp, OCp), lambda i: (0, 0))
    out_specs = (pl.BlockSpec((bm, OCp), lambda i: (i, 0)),
                 pl.BlockSpec((8, OCp), lambda i: (i, 0)))
    out_shape = (jax.ShapeDtypeStruct((Mp, OCp), jnp.float32),
                 jax.ShapeDtypeStruct((nt * 8, OCp), jnp.float32))
    cparams = pltpu.CompilerParams(dimension_semantics=("parallel",),
                                   vmem_limit_bytes=_VMEM_LIMIT)
    if bias is not None:
        kern = functools.partial(_mm_bias_stats_kernel, m_valid=m_valid,
                                 block_m=bm, masked=masked)
        in_specs = [x_spec, w_spec, pl.BlockSpec((1, OCp), lambda i: (0, 0))]
        args = (x2d, w2d, bias.astype(jnp.float32))
    else:
        kern = functools.partial(_mm_stats_kernel, m_valid=m_valid,
                                 block_m=bm, masked=masked)
        in_specs = [x_spec, w_spec]
        args = (x2d, w2d)

    y, stats = pl.pallas_call(
        kern, out_shape=out_shape, grid=(nt,),
        in_specs=in_specs, out_specs=out_specs,
        compiler_params=cparams,
    )(*args)
    return y, stats


def scale_shift_relu(x, scale, shift, *, out_dtype, block_m=512):
    Mp, Cp = x.shape
    bm = min(block_m, Mp)
    nt = Mp // bm
    row_spec = pl.BlockSpec((bm, Cp), lambda i: (i, 0))
    vec_spec = pl.BlockSpec((1, Cp), lambda i: (0, 0))
    return pl.pallas_call(
        _scale_shift_relu_kernel,
        out_shape=jax.ShapeDtypeStruct((Mp, Cp), out_dtype),
        grid=(nt,),
        in_specs=[row_spec, vec_spec, vec_spec],
        out_specs=row_spec,
        compiler_params=pltpu.CompilerParams(dimension_semantics=("parallel",),
                                             vmem_limit_bytes=_VMEM_LIMIT),
    )(x, scale, shift)


def bn_add_relu(main, res, s_main, t_main, s_res, t_res, *, block_m=512):
    Mp, Cp = main.shape
    bm = min(block_m, Mp)
    nt = Mp // bm
    row_spec = pl.BlockSpec((bm, Cp), lambda i: (i, 0))
    vec_spec = pl.BlockSpec((1, Cp), lambda i: (0, 0))
    return pl.pallas_call(
        _bn_add_relu_kernel,
        out_shape=jax.ShapeDtypeStruct((Mp, Cp), jnp.float32),
        grid=(nt,),
        in_specs=[row_spec, row_spec, vec_spec, vec_spec, vec_spec, vec_spec],
        out_specs=row_spec,
        compiler_params=pltpu.CompilerParams(dimension_semantics=("parallel",),
                                             vmem_limit_bytes=_VMEM_LIMIT),
    )(main, res, s_main, t_main, s_res, t_res)


# ------------------------------------------------------------------ JAX glue

def _bn_scale_shift(stats, m_valid, gamma, beta, cp, eps=1e-5):
    """Fold batch stats + affine into per-channel scale/shift (lane-padded)."""
    st = stats.reshape(-1, 8, cp)
    ssum = st[:, 0, :].sum(axis=0)
    ssq = st[:, 1, :].sum(axis=0)
    mean = ssum / m_valid
    var = jnp.maximum(ssq / m_valid - mean * mean, 0.0)   # biased, torch train-mode
    g = jnp.pad(gamma.astype(jnp.float32), (0, cp - gamma.shape[0]))
    b = jnp.pad(beta.astype(jnp.float32), (0, cp - beta.shape[0]))
    scale = g * jax.lax.rsqrt(var + eps)
    shift = b - mean * scale
    return scale.reshape(1, cp), shift.reshape(1, cp)


def _im2col(x_nhwc, kh, kw, stride, pad):
    N, H, W, C = x_nhwc.shape
    xp = jnp.pad(x_nhwc, ((0, 0), (pad, pad), (pad, pad), (0, 0)))
    OH = (H + 2 * pad - kh) // stride + 1
    OW = (W + 2 * pad - kw) // stride + 1
    cols = []
    for i in range(kh):
        for j in range(kw):
            cols.append(xp[:, i:i + stride * OH:stride, j:j + stride * OW:stride, :])
    patches = jnp.stack(cols, axis=3).reshape(N * OH * OW, kh * kw * C)
    return patches, OH, OW


def _grouped_weight_dense(w, groups, icp, ocp):
    """Grouped (OC, IC/g, KH, KW) conv weight -> dense block-diag (KH*KW*icp, ocp)."""
    OC, ICg, KH, KW = w.shape
    assert OC % groups == 0
    OCg = OC // groups
    wg = jnp.transpose(w.reshape(groups, OCg, ICg, KH, KW), (3, 4, 0, 2, 1))
    dense = jnp.zeros((KH, KW, icp, ocp), jnp.float32)
    for g in range(groups):
        dense = dense.at[:, :, g * ICg:(g + 1) * ICg,
                         g * OCg:(g + 1) * OCg].set(wg[:, :, g])
    return dense.reshape(KH * KW * icp, ocp)


# ------------------------------------------------------------------ forward

def resnext_block_forward(x_nchw, p, *, mxu_dtype=jnp.bfloat16, block_m=512):
    stride, groups = p["stride"], p["cardinality"]
    w1, w2, w3 = p["w1"], p["w2"], p["w3"]
    mid, cin = w1.shape[0], w1.shape[1]
    out_c = w3.shape[0]
    N, C, H, W = x_nchw.shape
    assert C == cin
    cin_p, mid_p, out_p = _rup(cin, LANE), _rup(mid, LANE), _rup(out_c, LANE)

    x_nhwc = jnp.transpose(x_nchw, (0, 2, 3, 1)).astype(jnp.float32)
    M1 = N * H * W
    x2d = x_nhwc.reshape(M1, cin)

    # ---- conv1 (1x1, bias) -> bn1 -> relu --------------------------------
    w1_2d = _pad_to(w1.reshape(mid, cin).T, rows=cin_p, cols=mid_p).astype(mxu_dtype)
    b1 = _pad_to(p["b1"].reshape(1, mid), cols=mid_p)
    c1, st1 = conv_matmul_stats(_pad_to(x2d, cols=cin_p).astype(mxu_dtype),
                                w1_2d, b1, m_valid=M1, block_m=block_m)
    s1, t1 = _bn_scale_shift(st1, M1, p["g1"], p["be1"], mid_p)
    y1 = scale_shift_relu(c1, s1, t1, out_dtype=mxu_dtype, block_m=block_m)

    # ---- conv2 (3x3, grouped, stride, bias) -> bn2 -> relu ----------------
    y1_nhwc = y1[:M1].reshape(N, H, W, mid_p)
    patches, OH, OW = _im2col(y1_nhwc, 3, 3, stride, 1)          # (M2, 9*mid_p)
    M2 = N * OH * OW
    w2_2d = _grouped_weight_dense(w2, groups, mid_p, mid_p).astype(mxu_dtype)
    b2 = _pad_to(p["b2"].reshape(1, mid), cols=mid_p)
    c2, st2 = conv_matmul_stats(patches, w2_2d, b2, m_valid=M2, block_m=block_m)
    s2, t2 = _bn_scale_shift(st2, M2, p["g2"], p["be2"], mid_p)
    y2 = scale_shift_relu(c2, s2, t2, out_dtype=mxu_dtype, block_m=block_m)

    # ---- conv3 (1x1, bias); bn3 is fused into the final kernel ------------
    w3_2d = _pad_to(w3.reshape(out_c, mid).T, rows=mid_p, cols=out_p).astype(mxu_dtype)
    b3 = _pad_to(p["b3"].reshape(1, out_c), cols=out_p)
    c3, st3 = conv_matmul_stats(y2, w3_2d, b3, m_valid=M2, block_m=block_m)
    s3, t3 = _bn_scale_shift(st3, M2, p["g3"], p["be3"], out_p)

    # ---- residual branch ---------------------------------------------------
    M2p = c3.shape[0]
    if p["downsample"]:
        xs2d = x_nhwc[:, ::stride, ::stride, :].reshape(M2, cin)
        wd_2d = _pad_to(p["wd"].reshape(out_c, cin).T,
                        rows=cin_p, cols=out_p).astype(mxu_dtype)
        cd, std = conv_matmul_stats(_pad_to(xs2d, cols=cin_p).astype(mxu_dtype),
                                    wd_2d, None, m_valid=M2, block_m=block_m)
        sd, td = _bn_scale_shift(std, M2, p["gd"], p["bed"], out_p)
        res = cd
    else:
        res = _pad_to(x2d, rows=M2p, cols=out_p)
        sd = _pad_to(jnp.ones((1, out_c), jnp.float32), cols=out_p)
        td = jnp.zeros((1, out_p), jnp.float32)

    # ---- fused bn3(main) + bn_d(residual) + add + relu ---------------------
    o = bn_add_relu(c3, res, s3, t3, sd, td, block_m=block_m)
    out = o[:M2, :out_c].reshape(N, OH, OW, out_c)
    return jnp.transpose(out, (0, 3, 1, 2))                      # NHWC -> NCHW


# ------------------------------------------------------------------ params

def make_params(key, in_channels, out_channels, stride=1, cardinality=32,
                reduction=16):
    mid = cardinality * out_channels // reduction
    assert mid % cardinality == 0
    ks = jax.random.split(key, 16)

    def uconv(k, oc, ic, kh, kw):
        bound = 1.0 / math.sqrt(ic * kh * kw)
        return jax.random.uniform(k, (oc, ic, kh, kw), jnp.float32, -bound, bound)

    def ubias(k, oc, fan_in):
        bound = 1.0 / math.sqrt(fan_in)
        return jax.random.uniform(k, (oc,), jnp.float32, -bound, bound)

    p = dict(stride=stride, cardinality=cardinality,
             downsample=(stride != 1 or in_channels != out_channels))
    p["w1"] = uconv(ks[0], mid, in_channels, 1, 1)
    p["b1"] = ubias(ks[1], mid, in_channels)
    p["w2"] = uconv(ks[2], mid, mid // cardinality, 3, 3)
    p["b2"] = ubias(ks[3], mid, (mid // cardinality) * 9)
    p["w3"] = uconv(ks[4], out_channels, mid, 1, 1)
    p["b3"] = ubias(ks[5], out_channels, mid)
    # BN affine params (PyTorch inits gamma=1, beta=0; perturb for a stronger test)
    p["g1"] = 1.0 + 0.1 * jax.random.normal(ks[6], (mid,), jnp.float32)
    p["be1"] = 0.1 * jax.random.normal(ks[7], (mid,), jnp.float32)
    p["g2"] = 1.0 + 0.1 * jax.random.normal(ks[8], (mid,), jnp.float32)
    p["be2"] = 0.1 * jax.random.normal(ks[9], (mid,), jnp.float32)
    p["g3"] = 1.0 + 0.1 * jax.random.normal(ks[10], (out_channels,), jnp.float32)
    p["be3"] = 0.1 * jax.random.normal(ks[11], (out_channels,), jnp.float32)
    if p["downsample"]:
        p["wd"] = uconv(ks[12], out_channels, in_channels, 1, 1)
        p["gd"] = 1.0 + 0.1 * jax.random.normal(ks[13], (out_channels,), jnp.float32)
        p["bed"] = 0.1 * jax.random.normal(ks[14], (out_channels,), jnp.float32)
    return p


# ------------------------------------------------------------------ reference

def reference_forward(x_nchw, p, conv_dtype=jnp.float32):
    """Pure-JAX lax.conv reference (train-mode BN). conv_dtype matches the
    kernel's MXU operand precision (bf16 or f32); accumulation is f32."""

    def conv(x, w, b, stride, pad, groups=1):
        out = jax.lax.conv_general_dilated(
            x.astype(conv_dtype), w.astype(conv_dtype),
            window_strides=(stride, stride), padding=[(pad, pad), (pad, pad)],
            dimension_numbers=("NCHW", "OIHW", "NCHW"),
            feature_group_count=groups,
            preferred_element_type=jnp.float32)
        if b is not None:
            out = out + b[None, :, None, None]
        return out

    def bn(x, g, b, eps=1e-5):
        m = x.mean(axis=(0, 2, 3), keepdims=True)
        v = ((x - m) ** 2).mean(axis=(0, 2, 3), keepdims=True)
        return (x - m) * jax.lax.rsqrt(v + eps) * g[None, :, None, None] \
            + b[None, :, None, None]

    relu = lambda t: jnp.maximum(t, 0.0)
    x = x_nchw.astype(jnp.float32)
    y = relu(bn(conv(x, p["w1"], p["b1"], 1, 0), p["g1"], p["be1"]))
    y = relu(bn(conv(y, p["w2"], p["b2"], p["stride"], 1,
                     groups=p["cardinality"]), p["g2"], p["be2"]))
    y = bn(conv(y, p["w3"], p["b3"], 1, 0), p["g3"], p["be3"])
    if p["downsample"]:
        r = bn(conv(x, p["wd"], None, p["stride"], 0), p["gd"], p["bed"])
    else:
        r = x
    return relu(y + r)


# ------------------------------------------------------------------ main

if __name__ == "__main__":
    key = jax.random.PRNGKey(0)
    kx1, kp1, kx2, kp2 = jax.random.split(key, 4)

    # Config A: stride-2 block with 1x1-conv+BN downsample branch; bf16 MXU path.
    #   in=16, out=32, cardinality=32, reduction=16 -> mid=64 (32 groups of 2 ch).
    xa = jax.random.normal(kx1, (2, 16, 16, 16), jnp.float32)       # NCHW
    pa = make_params(kp1, in_channels=16, out_channels=32, stride=2)
    out_a = jax.block_until_ready(resnext_block_forward(xa, pa,
                                                        mxu_dtype=jnp.bfloat16))
    assert out_a.shape == (2, 32, 8, 8), out_a.shape
    ref_a = jax.block_until_ready(reference_forward(xa, pa, conv_dtype=jnp.bfloat16))
    assert jnp.allclose(out_a, ref_a, rtol=5e-3, atol=5e-3), \
        float(jnp.max(jnp.abs(out_a - ref_a)))

    # Config B: stride-1, in==out -> identity residual; f32 MXU path (tight check).
    xb = jax.random.normal(kx2, (2, 32, 16, 16), jnp.float32)
    pb = make_params(kp2, in_channels=32, out_channels=32, stride=1)
    out_b = jax.block_until_ready(resnext_block_forward(xb, pb,
                                                        mxu_dtype=jnp.float32))
    assert out_b.shape == (2, 32, 16, 16), out_b.shape
    ref_b = jax.block_until_ready(reference_forward(xb, pb, conv_dtype=jnp.float32))
    assert jnp.allclose(out_b, ref_b, rtol=1e-3, atol=1e-3), \
        float(jnp.max(jnp.abs(out_b - ref_b)))

    print("KERNEL_OK")
</pallas_src>

<mosaic_0001>
module attributes {stable_mosaic.version = 11 : i64} {
  func.func @_mm_bias_stats_kernel(%arg0: i32, %arg1: memref<512x128xbf16, #tpu.memory_space<vmem>>, %arg2: memref<128x128xbf16, #tpu.memory_space<vmem>>, %arg3: memref<1x128xf32, #tpu.memory_space<vmem>>, %arg4: memref<512x128xf32, #tpu.memory_space<vmem>>, %arg5: memref<8x128xf32, #tpu.memory_space<vmem>>) attributes {dimension_semantics = [#tpu.dimension_semantics<parallel>], iteration_bounds = array<i64: 1>, scalar_prefetch = 0 : i64, scratch_operands = 0 : i64, tpu.core_type = #tpu.core_type<tc>, window_params = [{transform_indices = @transform_0, window_bounds = array<i64: 512, 128>}, {pipeline_mode = #tpu.pipeline_mode<synchronous>, transform_indices = @transform_1, window_bounds = array<i64: 128, 128>}, {pipeline_mode = #tpu.pipeline_mode<synchronous>, transform_indices = @transform_2, window_bounds = array<i64: 1, 128>}, {transform_indices = @transform_3, window_bounds = array<i64: 512, 128>}, {transform_indices = @transform_4, window_bounds = array<i64: 8, 128>}]} {
    %c0 = arith.constant 0 : index
    %c0_0 = arith.constant 0 : index
    %0 = vector.load %arg1[%c0, %c0_0] : memref<512x128xbf16, #tpu.memory_space<vmem>>, vector<512x128xbf16>
    %c0_1 = arith.constant 0 : index
    %c0_2 = arith.constant 0 : index
    %1 = vector.load %arg2[%c0_1, %c0_2] : memref<128x128xbf16, #tpu.memory_space<vmem>>, vector<128x128xbf16>
    %cst = arith.constant dense<0.000000e+00> : vector<512x128xf32>
    %2 = tpu.matmul %0, %1, %cst {dimension_numbers = #tpu.dot_dimension_numbers<[1], [0], [0], [1], [0, 0, 1, 1], [], []>} : vector<512x128xbf16>, vector<128x128xbf16>, vector<512x128xf32> -> vector<512x128xf32>
    %c0_3 = arith.constant 0 : index
    %c0_4 = arith.constant 0 : index
    %3 = vector.load %arg3[%c0_3, %c0_4] : memref<1x128xf32, #tpu.memory_space<vmem>>, vector<1x128xf32>
    %4 = vector.broadcast %3 : vector<1x128xf32> to vector<512x128xf32>
    %5 = arith.addf %2, %4 : vector<512x128xf32>
    %c0_5 = arith.constant 0 : index
    %c0_6 = arith.constant 0 : index
    %6 = vector.load %arg4[%c0_5, %c0_6] : memref<512x128xf32, #tpu.memory_space<vmem>>, vector<512x128xf32>
    tpu.vector_store %arg4[%c0_5, %c0_6], %5 {strides = array<i32>} : memref<512x128xf32, #tpu.memory_space<vmem>>, vector<512x128xf32>,
    %cst_7 = arith.constant dense<0.000000e+00> : vector<128xf32>
    %7 = vector.multi_reduction <add>, %5, %cst_7 [0] : vector<512x128xf32> to vector<128xf32>
    %8 = vector.shape_cast %7 : vector<128xf32> to vector<1x128xf32>
    %9 = arith.mulf %5, %5 : vector<512x128xf32>
    %cst_8 = arith.constant dense<0.000000e+00> : vector<128xf32>
    %10 = vector.multi_reduction <add>, %9, %cst_8 [0] : vector<512x128xf32> to vector<128xf32>
    %11 = vector.shape_cast %10 : vector<128xf32> to vector<1x128xf32>
    %12 = tpu.iota {dimensions = array<i32: 0>} : vector<8x128xi32>
    %c0_i32 = arith.constant 0 : i32
    %13 = vector.broadcast %c0_i32 : i32 to vector<8x128xi32>
    %14 = arith.cmpi eq, %12, %13 : vector<8x128xi32>
    %cst_9 = arith.constant 0.000000e+00 : f32
    %15 = vector.shape_cast %8 : vector<1x128xf32> to vector<1x128xf32>
    %16 = vector.broadcast %15 : vector<1x128xf32> to vector<8x128xf32>
    %17 = vector.broadcast %cst_9 : f32 to vector<8x128xf32>
    %18 = arith.select %14, %16, %17 : vector<8x128xi1>, vector<8x128xf32>
    %c1_i32 = arith.constant 1 : i32
    %19 = vector.broadcast %c1_i32 : i32 to vector<8x128xi32>
    %20 = arith.cmpi eq, %12, %19 : vector<8x128xi32>
    %cst_10 = arith.constant 0.000000e+00 : f32
    %21 = vector.shape_cast %11 : vector<1x128xf32> to vector<1x128xf32>
    %22 = vector.broadcast %21 : vector<1x128xf32> to vector<8x128xf32>
    %23 = vector.broadcast %cst_10 : f32 to vector<8x128xf32>
    %24 = arith.select %20, %22, %23 : vector<8x128xi1>, vector<8x128xf32>
    %25 = arith.addf %18, %24 : vector<8x128xf32>
    %c0_11 = arith.constant 0 : index
    %c0_12 = arith.constant 0 : index
    %26 = vector.load %arg5[%c0_11, %c0_12] : memref<8x128xf32, #tpu.memory_space<vmem>>, vector<8x128xf32>
    tpu.vector_store %arg5[%c0_11, %c0_12], %25 {strides = array<i32>} : memref<8x128xf32, #tpu.memory_space<vmem>>, vector<8x128xf32>,
    return
  }
  func.func @transform_0(%arg0: i32) -> (i32, i32) {
    %c0_i32 = arith.constant 0 : i32
    %c0_i32_0 = arith.constant 0 : i32
    return %arg0, %c0_i32 : i32, i32
  }
  func.func @transform_1(%arg0: i32) -> (i32, i32) {
    %c0_i32 = arith.constant 0 : i32
    %c0_i32_0 = arith.constant 0 : i32
    %c0_i32_1 = arith.constant 0 : i32
    return %c0_i32, %c0_i32_0 : i32, i32
  }
  func.func @transform_2(%arg0: i32) -> (i32, i32) {
    %c0_i32 = arith.constant 0 : i32
    %c0_i32_0 = arith.constant 0 : i32
    %c0_i32_1 = arith.constant 0 : i32
    return %c0_i32, %c0_i32_0 : i32, i32
  }
  func.func @transform_3(%arg0: i32) -> (i32, i32) {
    %c0_i32 = arith.constant 0 : i32
    %c0_i32_0 = arith.constant 0 : i32
    return %arg0, %c0_i32 : i32, i32
  }
  func.func @transform_4(%arg0: i32) -> (i32, i32) {
    %c0_i32 = arith.constant 0 : i32
    %c0_i32_0 = arith.constant 0 : i32
    return %arg0, %c0_i32 : i32, i32
  }
}

</mosaic_0001>

<bundles_post_ra>
// kernel: tpu_custom_call.1
= control target key start
LH: loop header
LB: loop body
LE: loop exit
PB: predicated region body
PF: predicated region fallthrough
CT: control target
= control target key end

     0   :  { %10 = vsyncpa [#allocation3], 0  ;;  %s1632_s0 = inlined_call_operand.hbm [shape: bf16[512,128], index: 0, kind: input, shape index: {}]   ;;  %s1633_s1 = inlined_call_operand.hbm [shape: bf16[128,128], index: 1, kind: input, shape index: {}]   ;;  %s1634_s2 = inlined_call_operand.vmem [shape: f32[1,128], index: 2, kind: input, shape index: {}]   ;;  %s1635_s3 = inlined_call_operand.hbm [shape: f32[512,128], index: 3, kind: output, shape index: {0}]   ;;  %s1636_s4 = inlined_call_operand.hbm [shape: f32[8,128], index: 4, kind: output, shape index: {1}]  }
   0x1   :  { %11 = vsyncpa [#allocation6], 0 }
   0x2   :  { %12 = vsyncpa [#allocation4], 0 }
   0x3   :  { %13 = vsyncpa [#allocation9], 0  ;;  %s1290_s15 = smov [#allocation2]   ;;  %s1194_s19 = scalar_lea.hbm %s1632_s0, 4096 }
   0x4   :  { %s19_s16 = sshll.u32 %s1290_s15, 4  ;;  %p1195_p0 = scmp.ne.s32.totalorder %s1632_s0, %s1194_s19  ;;  %s20_s16 = int_to_ptr.vmem [resolvable:$true] %s19_s16 }
   0x5   :  { %p1198_p1 = scmp.lt.u32.totalorder %s1194_s19, %s1632_s0 }
   0x7   :  { %p1200_p2 = pnand %p1198_p1, %p1195_p0 }
   0x9   :  { %1203 = shalt.err (!%p1200_p2)
}
   0xa   :  { %s1204_s24 = scalar_lea.vmem %s20_s16, 4096  ;;  %p1209_p4 = scmp.lt.s32.totalorder %s20_s16, %s20_s16 }
   0xb   :  { %p1205_p3 = scmp.ne.s32.totalorder %s20_s16, %s1204_s24  ;;  %p1210_p5 = scmp.lt.s32.totalorder %s1204_s24, %s1204_s24 }
   0xd   :  { %p1211_p6 = por %p1210_p5, %p1209_p4 }
   0xf   :  { %p1212_p7 = pnand %p1211_p6, %p1205_p3 }
  0x11   :  { %1215 = shalt.err (!%p1212_p7)
}
  0x12   :  { %s1291_s25 = smov 64   ;;  %s1292_s26 = smov 4  }
  0x13   :  { %25 = dma.hbm_to_vmem [thread:$0]  %s1632_s0, 4096, %s20_s16, [#allocation3], %s1291_s25, %s1291_s25, %s1292_s26  }
  0x14   :  { %s1293_s29 = smov [#allocation5]   ;;  %s1216_s7 = scalar_lea.hbm %s1633_s1, 1024 }
  0x15   :  { %s31_s30 = sshll.u32 %s1293_s29, 4  ;;  %p1217_p8 = scmp.ne.s32.totalorder %s1633_s1, %s1216_s7  ;;  %s32_s30 = int_to_ptr.vmem [resolvable:$true] %s31_s30 }
  0x16   :  { %p1220_p9 = scmp.lt.u32.totalorder %s1216_s7, %s1633_s1 }
  0x18   :  { %p1222_p10 = pnand %p1220_p9, %p1217_p8 }
  0x1a   :  { %1225 = shalt.err (!%p1222_p10)
}
  0x1b   :  { %s1226_s12 = scalar_lea.vmem %s32_s30, 1024  ;;  %p1231_p12 = scmp.lt.s32.totalorder %s32_s30, %s32_s30 }
  0x1c   :  { %p1227_p11 = scmp.ne.s32.totalorder %s32_s30, %s1226_s12  ;;  %p1232_p13 = scmp.lt.s32.totalorder %s1226_s12, %s1226_s12 }
  0x1e   :  { %p1233_p0 = por %p1232_p13, %p1231_p12 }
  0x20   :  { %p1234_p1 = pnand %p1233_p0, %p1227_p11 }
  0x22   :  { %1237 = shalt.err (!%p1234_p1)
}
  0x23   :  { %37 = dma.hbm_to_vmem [thread:$0]  %s1633_s1, 1024, %s32_s30, [#allocation6], %s1291_s25, %s1291_s25, %s1292_s26  }
  0x24   :  { %1282 = dma.done.wait [#allocation3], 4096  }
  0x25   :  { %1283 = vsyncadd [#allocation3], 4294963200 }
  0x26   :  { %1284 = dma.done.wait [#allocation6], 1024  }
  0x27   :  { %1285 = vsyncadd [#allocation6], 4294966272  ;;  %v1154_v0 = vld [vmem:[#allocation5] sm:$0xff]   ;;  %v1155_v1 = vld [vmem:[#allocation5 + $0x8] sm:$0xff]  }
  0x28   :  { %1050 = vmatprep.subr.bf16.mxu0 %v1154_v0  ;;  %1130 = vmatprep.subr.bf16.mxu1 %v1154_v0  ;;  %v1156_v2 = vld [vmem:[#allocation5 + $0x10] sm:$0xff]   ;;  %v1157_v3 = vld [vmem:[#allocation5 + $0x18] sm:$0xff]   ;;  %v1162_v4 = vld [vmem:[#allocation2] sm:$0xff]  }
  0x29   :  { %1051 = vmatpush3.bf16.msra.mxu0 %v1154_v0  ;;  %1138 = vmatpush3.bf16.msra.mxu1 %v1154_v0  ;;  %v1158_v5 = vld [vmem:[#allocation5 + $0x20] sm:$0xff]   ;;  %v1159_v6 = vld [vmem:[#allocation5 + $0x28] sm:$0xff]   ;;  %v1160_v7 = vld [vmem:[#allocation5 + $0x30] sm:$0xff]  }
  0x2a   :  { %1052 = vmatprep.subr.bf16.mxu0 %v1155_v1  ;;  %1131 = vmatprep.subr.bf16.mxu1 %v1155_v1  ;;  %v1161_v8 = vld [vmem:[#allocation5 + $0x38] sm:$0xff]   ;;  %v1178_v9 = vld [vmem:[#allocation2 + $0x80] sm:$0xff]   ;;  %v1163_v10 = vld [vmem:[#allocation2 + $0x8] sm:$0xff]  }
  0x2b   :  { %1066 = vmatprep.mubr.bf16.mxu0 %v1162_v4  ;;  %1098 = vmatprep.mubr.bf16.mxu1 %v1178_v9  ;;  %v1164_v11 = vld [vmem:[#allocation2 + $0x10] sm:$0xff]   ;;  %v1179_v12 = vld [vmem:[#allocation2 + $0x88] sm:$0xff]   ;;  %v1165_v14 = vld [vmem:[#allocation2 + $0x18] sm:$0xff]  }
  0x2c   :  { %v1180_v13 = vld [vmem:[#allocation2 + $0x90] sm:$0xff]   ;;  %v1166_v15 = vld [vmem:[#allocation2 + $0x20] sm:$0xff]   ;;  %v1181_v16 = vld [vmem:[#allocation2 + $0x98] sm:$0xff]  }
  0x2d   :  { %1053 = vmatpush3.bf16.msra.mxu0 %v1155_v1  ;;  %1139 = vmatpush3.bf16.msra.mxu1 %v1155_v1  ;;  %v1182_v17 = vld [vmem:[#allocation2 + $0xa0] sm:$0xff]   ;;  %v1167_v18 = vld [vmem:[#allocation2 + $0x28] sm:$0xff]   ;;  %v1168_v20 = vld [vmem:[#allocation2 + $0x30] sm:$0xff]  }
  0x2e   :  { %1054 = vmatprep.subr.bf16.mxu0 %v1156_v2  ;;  %1132 = vmatprep.subr.bf16.mxu1 %v1156_v2  ;;  %v1183_v19 = vld [vmem:[#allocation2 + $0xa8] sm:$0xff]   ;;  %v1184_v21 = vld [vmem:[#allocation2 + $0xb0] sm:$0xff]   ;;  %v1169_v22 = vld [vmem:[#allocation2 + $0x38] sm:$0xff]  }
  0x2f   :  { %v1185_v23 = vld [vmem:[#allocation2 + $0xb8] sm:$0xff]   ;;  %v1170_v24 = vld [vmem:[#allocation2 + $0x40] sm:$0xff]   ;;  %v1171_v26 = vld [vmem:[#allocation2 + $0x48] sm:$0xff]  }
  0x30   :  { %v1186_v25 = vld [vmem:[#allocation2 + $0xc0] sm:$0xff]   ;;  %v1187_v27 = vld [vmem:[#allocation2 + $0xc8] sm:$0xff]   ;;  %v1172_v28 = vld [vmem:[#allocation2 + $0x50] sm:$0xff]  }
  0x31   :  { %1055 = vmatpush3.bf16.msra.mxu0 %v1156_v2  ;;  %1140 = vmatpush3.bf16.msra.mxu1 %v1156_v2  ;;  %v1188_v29 = vld [vmem:[#allocation2 + $0xd0] sm:$0xff]   ;;  %v1173_v30 = vld [vmem:[#allocation2 + $0x58] sm:$0xff]   ;;  %v1174_v32 = vld [vmem:[#allocation2 + $0x60] sm:$0xff]  }
  0x32   :  { %1056 = vmatprep.subr.bf16.mxu0 %v1157_v3  ;;  %1133 = vmatprep.subr.bf16.mxu1 %v1157_v3  ;;  %v1189_v31 = vld [vmem:[#allocation2 + $0xd8] sm:$0xff]   ;;  %v1190_v33 = vld [vmem:[#allocation2 + $0xe0] sm:$0xff]   ;;  %v1175_v34 = vld [vmem:[#allocation2 + $0x68] sm:$0xff]  }
  0x33   :  { %v1191_v35 = vld [vmem:[#allocation2 + $0xe8] sm:$0xff]   ;;  %v1176_v36 = vld [vmem:[#allocation2 + $0x70] sm:$0xff]   ;;  %v1177_v38 = vld [vmem:[#allocation2 + $0x78] sm:$0xff]  }
  0x34   :  { %v1192_v37 = vld [vmem:[#allocation2 + $0xf0] sm:$0xff]   ;;  %v1193_v39 = vld [vmem:[#allocation2 + $0xf8] sm:$0xff]   ;;  %v1350_v40 = vld [vmem:[%s1634_s2] ss:$0 sm:$0xff]  ;;  %s1294_s2 = smov [#allocation7]  }
  0x35   :  { %1057 = vmatpush3.bf16.msra.mxu0 %v1157_v3  ;;  %1141 = vmatpush3.bf16.msra.mxu1 %v1157_v3  ;;  %s942_s15 = sshll.u32 %s1294_s2, 4  ;;  %s943_s15 = int_to_ptr.vmem [resolvable:$true] %s942_s15 }
  0x36   :  { %1058 = vmatprep.subr.bf16.mxu0 %v1158_v5  ;;  %1134 = vmatprep.subr.bf16.mxu1 %v1158_v5  ;;  %s1238_s16 = scalar_lea.vmem %s943_s15, 8192  ;;  %p1243_p3 = scmp.lt.s32.totalorder %s943_s15, %s943_s15 }
  0x37   :  { %p1239_p2 = scmp.ne.s32.totalorder %s943_s15, %s1238_s16  ;;  %p1244_p4 = scmp.lt.s32.totalorder %s1238_s16, %s1238_s16 }
  0x39   :  { %1059 = vmatpush3.bf16.msra.mxu0 %v1158_v5  ;;  %1142 = vmatpush3.bf16.msra.mxu1 %v1158_v5  ;;  %p1245_p5 = por %p1244_p4, %p1243_p3 }
  0x3a   :  { %1060 = vmatprep.subr.bf16.mxu0 %v1159_v6  ;;  %1135 = vmatprep.subr.bf16.mxu1 %v1159_v6 }
  0x3b   :  { %p1246_p6 = pnand %p1245_p5, %p1239_p2 }
  0x3d   :  { %1061 = vmatpush3.bf16.msra.mxu0 %v1159_v6  ;;  %1143 = vmatpush3.bf16.msra.mxu1 %v1159_v6 }
  0x3e   :  { %1062 = vmatprep.subr.bf16.mxu0 %v1160_v7  ;;  %1136 = vmatprep.subr.bf16.mxu1 %v1160_v7 }
  0x41   :  { %1063 = vmatpush3.bf16.msra.mxu0 %v1160_v7  ;;  %1144 = vmatpush3.bf16.msra.mxu1 %v1160_v7 }
  0x42   :  { %1064 = vmatprep.subr.bf16.mxu0 %v1161_v8  ;;  %1137 = vmatprep.subr.bf16.mxu1 %v1161_v8 }
  0x45   :  { %1065 = vmatpush3.bf16.msra.mxu0 %v1161_v8  ;;  %1145 = vmatpush3.bf16.msra.mxu1 %v1161_v8 }
  0x48   :  { %1067 = vmatmul.mubr.bf16.vlgmr.msra.gmra.mrb[0].mxu0 %v1163_v10  ;;  %1099 = vmatmul.mubr.bf16.vlgmr.msra.gmra.mrb[0].mxu1 %v1179_v12 }
  0x49   :  { %1070 = vmatprep.mubr.bf16.mxu0 %v1164_v11  ;;  %1102 = vmatprep.mubr.bf16.mxu1 %v1180_v13 }
  0x50   :  { %1071 = vmatmul.mubr.bf16.gmra.mrb[4].mxu0 %v1165_v14  ;;  %1103 = vmatmul.mubr.bf16.gmra.mrb[4].mxu1 %v1181_v16 }
  0x51   :  { %1074 = vmatprep.mubr.bf16.mxu0 %v1166_v15  ;;  %1106 = vmatprep.mubr.bf16.mxu1 %v1182_v17 }
  0x58   :  { %1075 = vmatmul.mubr.bf16.gmra.mrb[8].mxu0 %v1167_v18  ;;  %1107 = vmatmul.mubr.bf16.gmra.mrb[8].mxu1 %v1183_v19 }
  0x59   :  { %1078 = vmatprep.mubr.bf16.mxu0 %v1168_v20  ;;  %1110 = vmatprep.mubr.bf16.mxu1 %v1184_v21 }
  0x60   :  { %1079 = vmatmul.mubr.bf16.gmra.mrb[12].mxu0 %v1169_v22  ;;  %1111 = vmatmul.mubr.bf16.gmra.mrb[12].mxu1 %v1185_v23 }
  0x61   :  { %1082 = vmatprep.mubr.bf16.mxu0 %v1170_v24  ;;  %1114 = vmatprep.mubr.bf16.mxu1 %v1186_v25 }
  0x68   :  { %1083 = vmatmul.mubr.bf16.gmra.mrb[16].mxu0 %v1171_v26  ;;  %1115 = vmatmul.mubr.bf16.gmra.mrb[16].mxu1 %v1187_v27 }
  0x69   :  { %1086 = vmatprep.mubr.bf16.mxu0 %v1172_v28  ;;  %1118 = vmatprep.mubr.bf16.mxu1 %v1188_v29 }
  0x70   :  { %1087 = vmatmul.mubr.bf16.gmra.mrb[20].mxu0 %v1173_v30  ;;  %1119 = vmatmul.mubr.bf16.gmra.mrb[20].mxu1 %v1189_v31 }
  0x71   :  { %1090 = vmatprep.mubr.bf16.mxu0 %v1174_v32  ;;  %1122 = vmatprep.mubr.bf16.mxu1 %v1190_v33 }
  0x78   :  { %1091 = vmatmul.mubr.bf16.gmra.mrb[24].mxu0 %v1175_v34  ;;  %1123 = vmatmul.mubr.bf16.gmra.mrb[24].mxu1 %v1191_v35 }
  0x79   :  { %1094 = vmatprep.mubr.bf16.mxu0 %v1176_v36  ;;  %1126 = vmatprep.mubr.bf16.mxu1 %v1192_v37 }
  0x80   :  { %1095 = vmatmul.mubr.bf16.gmra.mrb[28].mxu0 %v1177_v38  ;;  %1127 = vmatmul.mubr.bf16.gmra.mrb[28].mxu1 %v1193_v39 }
 0x11b   :  { %v1068_v41 = vpop.f32.mrb[0].mxu0  ;;  %v1100_v42 = vpop.f32.mrb[0].mxu1 }
 0x11c   :  { %v417_v43 = vadd.f32 %v1068_v41, %v1350_v40  ;;  %v408_v44 = vpop.f32.mrb[1].mxu0  ;;  %v1354_v45 = vadd.f32 %v1100_v42, %v1350_v40  ;;  %v536_v46 = vpop.f32.mrb[1].mxu1 }
 0x11d   :  { %v409_v47 = vadd.f32 %v1350_v40, %v408_v44  ;;  %v1069_v48 = vpop.f32.mrb[2].mxu0  ;;  %v1358_v49 = vadd.f32 %v1350_v40, %v536_v46  ;;  %v1101_v50 = vpop.f32.mrb[2].mxu1 }
 0x11e   :  { %665 = vst [vmem:[#allocation7 + $0x10] sm:$0xff] %v417_v43  ;;  %v420_v51 = vadd.f32 %v1069_v48, %v1350_v40  ;;  %v411_v52 = vpop.f32.mrb[3].mxu0  ;;  %697 = vst [vmem:[#allocation7 + $0x110] sm:$0xff] %v1354_v45  ;;  %v1363_v53 = vadd.f32 %v1101_v50, %v1350_v40  ;;  %v539_v54 = vpop.f32.mrb[3].mxu1  ;;  %v798_v60 = vmul.f32 %v417_v43, %v417_v43 }
 0x11f   :  { %663 = vst [vmem:[#allocation7] sm:$0xff] %v409_v47  ;;  %v412_v55 = vadd.f32 %v1350_v40, %v411_v52  ;;  %695 = vst [vmem:[#allocation7 + $0x100] sm:$0xff] %v1358_v49  ;;  %v1368_v56 = vadd.f32 %v1350_v40, %v539_v54  ;;  %v796_v57 = vmul.f32 %v409_v47, %v409_v47 }
 0x120   :  { %666 = vst [vmem:[#allocation7 + $0x18] sm:$0xff] %v420_v51  ;;  %698 = vst [vmem:[#allocation7 + $0x118] sm:$0xff] %v1363_v53  ;;  %v799_v1 = vmul.f32 %v420_v51, %v420_v51 }
 0x121   :  { %664 = vst [vmem:[#allocation7 + $0x8] sm:$0xff] %v412_v55  ;;  %v727_v58 = vadd.f32 %v412_v55, %v409_v47  ;;  %v797_v59 = vmul.f32 %v412_v55, %v412_v55  ;;  %696 = vst [vmem:[#allocation7 + $0x108] sm:$0xff] %v1368_v56 }
 0x123   :  { %v728_v61 = vadd.f32 %v727_v58, %v417_v43  ;;  %v860_v62 = vadd.f32 %v797_v59, %v796_v57  ;;  %v1072_v63 = vpop.f32.mrb[4].mxu0  ;;  %v1104_v0 = vpop.f32.mrb[4].mxu1 }
 0x124   :  { %v433_v2 = vadd.f32 %v1072_v63, %v1350_v40  ;;  %v424_v3 = vpop.f32.mrb[5].mxu0  ;;  %v1374_v4 = vadd.f32 %v1104_v0, %v1350_v40  ;;  %v552_v5 = vpop.f32.mrb[5].mxu1 }
 0x125   :  { %v861_v6 = vadd.f32 %v860_v62, %v798_v60  ;;  %v425_v7 = vadd.f32 %v1350_v40, %v424_v3  ;;  %v729_v8 = vadd.f32 %v728_v61, %v420_v51  ;;  %v1073_v9 = vpop.f32.mrb[6].mxu0  ;;  %v1378_v10 = vadd.f32 %v1350_v40, %v552_v5  ;;  %v1105_v11 = vpop.f32.mrb[6].mxu1 }
 0x126   :  { %669 = vst [vmem:[#allocation7 + $0x30] sm:$0xff] %v433_v2  ;;  %v436_v12 = vadd.f32 %v1073_v9, %v1350_v40  ;;  %v427_v13 = vpop.f32.mrb[7].mxu0  ;;  %701 = vst [vmem:[#allocation7 + $0x130] sm:$0xff] %v1374_v4  ;;  %v1383_v14 = vadd.f32 %v1105_v11, %v1350_v40  ;;  %v555_v15 = vpop.f32.mrb[7].mxu1  ;;  %v802_v24 = vmul.f32 %v433_v2, %v433_v2 }
 0x127   :  { %667 = vst [vmem:[#allocation7 + $0x20] sm:$0xff] %v425_v7  ;;  %v730_v16 = vadd.f32 %v729_v8, %v425_v7  ;;  %v800_v17 = vmul.f32 %v425_v7, %v425_v7  ;;  %v862_v18 = vadd.f32 %v861_v6, %v799_v1  ;;  %v428_v19 = vadd.f32 %v1350_v40, %v427_v13 }
 0x128   :  { %699 = vst [vmem:[#allocation7 + $0x120] sm:$0xff] %v1378_v10  ;;  %670 = vst [vmem:[#allocation7 + $0x38] sm:$0xff] %v436_v12  ;;  %v1389_v20 = vadd.f32 %v1350_v40, %v555_v15  ;;  %v803_v29 = vmul.f32 %v436_v12, %v436_v12 }
 0x129   :  { %702 = vst [vmem:[#allocation7 + $0x138] sm:$0xff] %v1383_v14  ;;  %v863_v21 = vadd.f32 %v862_v18, %v800_v17  ;;  %668 = vst [vmem:[#allocation7 + $0x28] sm:$0xff] %v428_v19  ;;  %v731_v22 = vadd.f32 %v730_v16, %v428_v19  ;;  %v801_v23 = vmul.f32 %v428_v19, %v428_v19 }
 0x12a   :  { %700 = vst [vmem:[#allocation7 + $0x128] sm:$0xff] %v1389_v20 }
 0x12b   :  { %v732_v25 = vadd.f32 %v731_v22, %v433_v2  ;;  %v864_v26 = vadd.f32 %v863_v21, %v801_v23  ;;  %v1076_v27 = vpop.f32.mrb[8].mxu0  ;;  %v1108_v28 = vpop.f32.mrb[8].mxu1 }
 0x12c   :  { %v449_v30 = vadd.f32 %v1076_v27, %v1350_v40  ;;  %v440_v31 = vpop.f32.mrb[9].mxu0  ;;  %v1394_v32 = vadd.f32 %v1108_v28, %v1350_v40  ;;  %v568_v33 = vpop.f32.mrb[9].mxu1 }
 0x12d   :  { %v865_v34 = vadd.f32 %v864_v26, %v802_v24  ;;  %v441_v35 = vadd.f32 %v1350_v40, %v440_v31  ;;  %v733_v36 = vadd.f32 %v732_v25, %v436_v12  ;;  %v1077_v37 = vpop.f32.mrb[10].mxu0  ;;  %v1398_v38 = vadd.f32 %v1350_v40, %v568_v33  ;;  %v1109_v39 = vpop.f32.mrb[10].mxu1 }
 0x12e   :  { %673 = vst [vmem:[#allocation7 + $0x50] sm:$0xff] %v449_v30  ;;  %v452_v41 = vadd.f32 %v1077_v37, %v1350_v40  ;;  %v443_v42 = vpop.f32.mrb[11].mxu0  ;;  %705 = vst [vmem:[#allocation7 + $0x150] sm:$0xff] %v1394_v32  ;;  %v1403_v43 = vadd.f32 %v1109_v39, %v1350_v40  ;;  %v571_v44 = vpop.f32.mrb[11].mxu1  ;;  %v806_v57 = vmul.f32 %v449_v30, %v449_v30 }
 0x12f   :  { %671 = vst [vmem:[#allocation7 + $0x40] sm:$0xff] %v441_v35  ;;  %v734_v46 = vadd.f32 %v733_v36, %v441_v35  ;;  %v804_v47 = vmul.f32 %v441_v35, %v441_v35  ;;  %v866_v48 = vadd.f32 %v865_v34, %v803_v29  ;;  %v444_v50 = vadd.f32 %v1350_v40, %v443_v42 }
 0x130   :  { %703 = vst [vmem:[#allocation7 + $0x140] sm:$0xff] %v1398_v38  ;;  %674 = vst [vmem:[#allocation7 + $0x58] sm:$0xff] %v452_v41  ;;  %v1409_v51 = vadd.f32 %v1350_v40, %v571_v44  ;;  %v807_v62 = vmul.f32 %v452_v41, %v452_v41 }
 0x131   :  { %706 = vst [vmem:[#allocation7 + $0x158] sm:$0xff] %v1403_v43  ;;  %v867_v52 = vadd.f32 %v866_v48, %v804_v47  ;;  %672 = vst [vmem:[#allocation7 + $0x48] sm:$0xff] %v444_v50  ;;  %v735_v54 = vadd.f32 %v734_v46, %v444_v50  ;;  %v805_v55 = vmul.f32 %v444_v50, %v444_v50 }
 0x132   :  { %704 = vst [vmem:[#allocation7 + $0x148] sm:$0xff] %v1409_v51 }
 0x133   :  { %v736_v58 = vadd.f32 %v735_v54, %v449_v30  ;;  %v868_v59 = vadd.f32 %v867_v52, %v805_v55  ;;  %v1080_v60 = vpop.f32.mrb[12].mxu0  ;;  %v1112_v61 = vpop.f32.mrb[12].mxu1 }
 0x134   :  { %v465_v63 = vadd.f32 %v1080_v60, %v1350_v40  ;;  %v456_v0 = vpop.f32.mrb[13].mxu0  ;;  %v1414_v1 = vadd.f32 %v1112_v61, %v1350_v40  ;;  %v584_v2 = vpop.f32.mrb[13].mxu1 }
 0x135   :  { %v869_v3 = vadd.f32 %v868_v59, %v806_v57  ;;  %v457_v5 = vadd.f32 %v1350_v40, %v456_v0  ;;  %v737_v6 = vadd.f32 %v736_v58, %v452_v41  ;;  %v1081_v7 = vpop.f32.mrb[14].mxu0  ;;  %v1418_v8 = vadd.f32 %v1350_v40, %v584_v2  ;;  %v1113_v9 = vpop.f32.mrb[14].mxu1 }
 0x136   :  { %677 = vst [vmem:[#allocation7 + $0x70] sm:$0xff] %v465_v63  ;;  %v468_v11 = vadd.f32 %v1081_v7, %v1350_v40  ;;  %v459_v12 = vpop.f32.mrb[15].mxu0  ;;  %709 = vst [vmem:[#allocation7 + $0x170] sm:$0xff] %v1414_v1  ;;  %v1423_v13 = vadd.f32 %v1113_v9, %v1350_v40  ;;  %v587_v15 = vpop.f32.mrb[15].mxu1  ;;  %v810_v25 = vmul.f32 %v465_v63, %v465_v63 }
 0x137   :  { %675 = vst [vmem:[#allocation7 + $0x60] sm:$0xff] %v457_v5  ;;  %v738_v16 = vadd.f32 %v737_v6, %v457_v5  ;;  %v808_v17 = vmul.f32 %v457_v5, %v457_v5  ;;  %v870_v18 = vadd.f32 %v869_v3, %v807_v62  ;;  %v460_v19 = vadd.f32 %v1350_v40, %v459_v12 }
 0x138   :  { %707 = vst [vmem:[#allocation7 + $0x160] sm:$0xff] %v1418_v8  ;;  %678 = vst [vmem:[#allocation7 + $0x78] sm:$0xff] %v468_v11  ;;  %v1429_v21 = vadd.f32 %v1350_v40, %v587_v15  ;;  %v811_v30 = vmul.f32 %v468_v11, %v468_v11 }
 0x139   :  { %710 = vst [vmem:[#allocation7 + $0x178] sm:$0xff] %v1423_v13  ;;  %v871_v22 = vadd.f32 %v870_v18, %v808_v17  ;;  %676 = vst [vmem:[#allocation7 + $0x68] sm:$0xff] %v460_v19  ;;  %v739_v23 = vadd.f32 %v738_v16, %v460_v19  ;;  %v809_v24 = vmul.f32 %v460_v19, %v460_v19 }
 0x13a   :  { %708 = vst [vmem:[#allocation7 + $0x168] sm:$0xff] %v1429_v21 }
 0x13b   :  { %v740_v26 = vadd.f32 %v739_v23, %v465_v63  ;;  %v872_v27 = vadd.f32 %v871_v22, %v809_v24  ;;  %v1084_v28 = vpop.f32.mrb[16].mxu0  ;;  %v1116_v29 = vpop.f32.mrb[16].mxu1 }
 0x13c   :  { %v481_v31 = vadd.f32 %v1084_v28, %v1350_v40  ;;  %v472_v33 = vpop.f32.mrb[17].mxu0  ;;  %v1434_v34 = vadd.f32 %v1116_v29, %v1350_v40  ;;  %v600_v35 = vpop.f32.mrb[17].mxu1 }
 0x13d   :  { %v873_v36 = vadd.f32 %v872_v27, %v810_v25  ;;  %v473_v37 = vadd.f32 %v1350_v40, %v472_v33  ;;  %v741_v39 = vadd.f32 %v740_v26, %v468_v11  ;;  %v1085_v41 = vpop.f32.mrb[18].mxu0  ;;  %v1438_v42 = vadd.f32 %v1350_v40, %v600_v35  ;;  %v1117_v44 = vpop.f32.mrb[18].mxu1 }
 0x13e   :  { %681 = vst [vmem:[#allocation7 + $0x90] sm:$0xff] %v481_v31  ;;  %v484_v46 = vadd.f32 %v1085_v41, %v1350_v40  ;;  %v475_v47 = vpop.f32.mrb[19].mxu0  ;;  %713 = vst [vmem:[#allocation7 + $0x190] sm:$0xff] %v1434_v34  ;;  %v1443_v48 = vadd.f32 %v1117_v44, %v1350_v40  ;;  %v603_v50 = vpop.f32.mrb[19].mxu1  ;;  %v814_v62 = vmul.f32 %v481_v31, %v481_v31 }
 0x13f   :  { %679 = vst [vmem:[#allocation7 + $0x80] sm:$0xff] %v473_v37  ;;  %v742_v52 = vadd.f32 %v741_v39, %v473_v37  ;;  %v812_v54 = vmul.f32 %v473_v37, %v473_v37  ;;  %v874_v55 = vadd.f32 %v873_v36, %v811_v30  ;;  %v476_v57 = vadd.f32 %v1350_v40, %v475_v47 }
 0x140   :  { %711 = vst [vmem:[#allocation7 + $0x180] sm:$0xff] %v1438_v42  ;;  %682 = vst [vmem:[#allocation7 + $0x98] sm:$0xff] %v484_v46  ;;  %v1449_v58 = vadd.f32 %v1350_v40, %v603_v50  ;;  %v815_v5 = vmul.f32 %v484_v46, %v484_v46 }
 0x141   :  { %714 = vst [vmem:[#allocation7 + $0x198] sm:$0xff] %v1443_v48  ;;  %v875_v59 = vadd.f32 %v874_v55, %v812_v54  ;;  %680 = vst [vmem:[#allocation7 + $0x88] sm:$0xff] %v476_v57  ;;  %v743_v60 = vadd.f32 %v742_v52, %v476_v57  ;;  %v813_v61 = vmul.f32 %v476_v57, %v476_v57 }
 0x142   :  { %712 = vst [vmem:[#allocation7 + $0x188] sm:$0xff] %v1449_v58 }
 0x143   :  { %v744_v63 = vadd.f32 %v743_v60, %v481_v31  ;;  %v876_v0 = vadd.f32 %v875_v59, %v813_v61  ;;  %v1088_v2 = vpop.f32.mrb[20].mxu0  ;;  %v1120_v3 = vpop.f32.mrb[20].mxu1 }
 0x144   :  { %v497_v6 = vadd.f32 %v1088_v2, %v1350_v40  ;;  %v488_v7 = vpop.f32.mrb[21].mxu0  ;;  %v1454_v9 = vadd.f32 %v1120_v3, %v1350_v40  ;;  %v616_v11 = vpop.f32.mrb[21].mxu1 }
 0x145   :  { %v877_v12 = vadd.f32 %v876_v0, %v814_v62  ;;  %v489_v15 = vadd.f32 %v1350_v40, %v488_v7  ;;  %v745_v16 = vadd.f32 %v744_v63, %v484_v46  ;;  %v1089_v17 = vpop.f32.mrb[22].mxu0  ;;  %v1458_v18 = vadd.f32 %v1350_v40, %v616_v11  ;;  %v1121_v19 = vpop.f32.mrb[22].mxu1 }
 0x146   :  { %685 = vst [vmem:[#allocation7 + $0xb0] sm:$0xff] %v497_v6  ;;  %v500_v22 = vadd.f32 %v1089_v17, %v1350_v40  ;;  %v491_v23 = vpop.f32.mrb[23].mxu0  ;;  %717 = vst [vmem:[#allocation7 + $0x1b0] sm:$0xff] %v1454_v9  ;;  %v1463_v24 = vadd.f32 %v1121_v19, %v1350_v40  ;;  %v619_v25 = vpop.f32.mrb[23].mxu1  ;;  %v818_v36 = vmul.f32 %v497_v6, %v497_v6 }
 0x147   :  { %683 = vst [vmem:[#allocation7 + $0xa0] sm:$0xff] %v489_v15  ;;  %v746_v26 = vadd.f32 %v745_v16, %v489_v15  ;;  %v816_v27 = vmul.f32 %v489_v15, %v489_v15  ;;  %v878_v28 = vadd.f32 %v877_v12, %v815_v5  ;;  %v492_v29 = vadd.f32 %v1350_v40, %v491_v23 }
 0x148   :  { %715 = vst [vmem:[#allocation7 + $0x1a0] sm:$0xff] %v1458_v18  ;;  %686 = vst [vmem:[#allocation7 + $0xb8] sm:$0xff] %v500_v22  ;;  %v1469_v30 = vadd.f32 %v1350_v40, %v619_v25  ;;  %v819_v46 = vmul.f32 %v500_v22, %v500_v22 }
 0x149   :  { %718 = vst [vmem:[#allocation7 + $0x1b8] sm:$0xff] %v1463_v24  ;;  %v879_v31 = vadd.f32 %v878_v28, %v816_v27  ;;  %684 = vst [vmem:[#allocation7 + $0xa8] sm:$0xff] %v492_v29  ;;  %v747_v33 = vadd.f32 %v746_v26, %v492_v29  ;;  %v817_v35 = vmul.f32 %v492_v29, %v492_v29 }
 0x14a   :  { %716 = vst [vmem:[#allocation7 + $0x1a8] sm:$0xff] %v1469_v30 }
 0x14b   :  { %v748_v37 = vadd.f32 %v747_v33, %v497_v6  ;;  %v880_v39 = vadd.f32 %v879_v31, %v817_v35  ;;  %v1092_v41 = vpop.f32.mrb[24].mxu0  ;;  %v1124_v44 = vpop.f32.mrb[24].mxu1 }
 0x14c   :  { %v513_v47 = vadd.f32 %v1092_v41, %v1350_v40  ;;  %v504_v50 = vpop.f32.mrb[25].mxu0  ;;  %v1474_v52 = vadd.f32 %v1124_v44, %v1350_v40  ;;  %v632_v54 = vpop.f32.mrb[25].mxu1 }
 0x14d   :  { %v881_v55 = vadd.f32 %v880_v39, %v818_v36  ;;  %v505_v57 = vadd.f32 %v1350_v40, %v504_v50  ;;  %v749_v59 = vadd.f32 %v748_v37, %v500_v22  ;;  %v1093_v60 = vpop.f32.mrb[26].mxu0  ;;  %v1478_v61 = vadd.f32 %v1350_v40, %v632_v54  ;;  %v1125_v62 = vpop.f32.mrb[26].mxu1 }
 0x14e   :  { %689 = vst [vmem:[#allocation7 + $0xd0] sm:$0xff] %v513_v47  ;;  %v516_v63 = vadd.f32 %v1093_v60, %v1350_v40  ;;  %v507_v0 = vpop.f32.mrb[27].mxu0  ;;  %721 = vst [vmem:[#allocation7 + $0x1d0] sm:$0xff] %v1474_v52  ;;  %v1483_v2 = vadd.f32 %v1125_v62, %v1350_v40  ;;  %v635_v3 = vpop.f32.mrb[27].mxu1  ;;  %v822_v19 = vmul.f32 %v513_v47, %v513_v47 }
 0x14f   :  { %687 = vst [vmem:[#allocation7 + $0xc0] sm:$0xff] %v505_v57  ;;  %v750_v5 = vadd.f32 %v749_v59, %v505_v57  ;;  %v820_v6 = vmul.f32 %v505_v57, %v505_v57  ;;  %v882_v7 = vadd.f32 %v881_v55, %v819_v46  ;;  %v508_v11 = vadd.f32 %v1350_v40, %v507_v0 }
 0x150   :  { %719 = vst [vmem:[#allocation7 + $0x1c0] sm:$0xff] %v1478_v61  ;;  %690 = vst [vmem:[#allocation7 + $0xd8] sm:$0xff] %v516_v63  ;;  %v1489_v12 = vadd.f32 %v1350_v40, %v635_v3  ;;  %v823_v27 = vmul.f32 %v516_v63, %v516_v63 }
 0x151   :  { %722 = vst [vmem:[#allocation7 + $0x1d8] sm:$0xff] %v1483_v2  ;;  %v883_v15 = vadd.f32 %v882_v7, %v820_v6  ;;  %688 = vst [vmem:[#allocation7 + $0xc8] sm:$0xff] %v508_v11  ;;  %v751_v16 = vadd.f32 %v750_v5, %v508_v11  ;;  %v821_v17 = vmul.f32 %v508_v11, %v508_v11 }
 0x152   :  { %720 = vst [vmem:[#allocation7 + $0x1c8] sm:$0xff] %v1489_v12 }
 0x153   :  { %v752_v22 = vadd.f32 %v751_v16, %v513_v47  ;;  %v884_v23 = vadd.f32 %v883_v15, %v821_v17  ;;  %v1096_v25 = vpop.f32.mrb[28].mxu0  ;;  %v1128_v26 = vpop.f32.mrb[28].mxu1 }
 0x154   :  { %v529_v28 = vadd.f32 %v1096_v25, %v1350_v40  ;;  %v520_v29 = vpop.f32.mrb[29].mxu0  ;;  %v1494_v31 = vadd.f32 %v1128_v26, %v1350_v40  ;;  %v648_v33 = vpop.f32.mrb[29].mxu1 }
 0x155   :  { %v885_v35 = vadd.f32 %v884_v23, %v822_v19  ;;  %v521_v36 = vadd.f32 %v1350_v40, %v520_v29  ;;  %v753_v37 = vadd.f32 %v752_v22, %v516_v63  ;;  %v1097_v39 = vpop.f32.mrb[30].mxu0  ;;  %v1498_v41 = vadd.f32 %v1350_v40, %v648_v33  ;;  %v1129_v44 = vpop.f32.mrb[30].mxu1 }
 0x156   :  { %693 = vst [vmem:[#allocation7 + $0xf0] sm:$0xff] %v529_v28  ;;  %v532_v46 = vadd.f32 %v1097_v39, %v1350_v40  ;;  %v523_v47 = vpop.f32.mrb[31].mxu0  ;;  %725 = vst [vmem:[#allocation7 + $0x1f0] sm:$0xff] %v1494_v31  ;;  %v1503_v50 = vadd.f32 %v1129_v44, %v1350_v40  ;;  %v651_v54 = vpop.f32.mrb[31].mxu1  ;;  %v826_v5 = vmul.f32 %v529_v28, %v529_v28 }
 0x157   :  { %691 = vst [vmem:[#allocation7 + $0xe0] sm:$0xff] %v521_v36  ;;  %v754_v55 = vadd.f32 %v753_v37, %v521_v36  ;;  %v824_v57 = vmul.f32 %v521_v36, %v521_v36  ;;  %v886_v59 = vadd.f32 %v885_v35, %v823_v27  ;;  %v524_v60 = vadd.f32 %v1350_v40, %v523_v47 }
 0x158   :  { %723 = vst [vmem:[#allocation7 + $0x1e0] sm:$0xff] %v1498_v41  ;;  %694 = vst [vmem:[#allocation7 + $0xf8] sm:$0xff] %v532_v46  ;;  %v1509_v62 = vadd.f32 %v1350_v40, %v651_v54 }
 0x159   :  { %726 = vst [vmem:[#allocation7 + $0x1f8] sm:$0xff] %v1503_v50  ;;  %v887_v63 = vadd.f32 %v886_v59, %v824_v57  ;;  %692 = vst [vmem:[#allocation7 + $0xe8] sm:$0xff] %v524_v60  ;;  %v755_v0 = vadd.f32 %v754_v55, %v524_v60  ;;  %v825_v3 = vmul.f32 %v524_v60, %v524_v60 }
 0x15a   :  { %724 = vst [vmem:[#allocation7 + $0x1e8] sm:$0xff] %v1509_v62 }
 0x15b   :  { %v756_v6 = vadd.f32 %v755_v0, %v529_v28  ;;  %v888_v7 = vadd.f32 %v887_v63, %v825_v3 }
 0x15c   :  { %1249 = shalt.err (!%p1246_p6)
}
 0x15d   :  { %s1250_s19 = scalar_lea.hbm %s1635_s3, 8192 }
 0x15e   :  { %p1251_p7 = scmp.ne.s32.totalorder %s1635_s3, %s1250_s19  ;;  %p1254_p8 = scmp.lt.u32.totalorder %s1250_s19, %s1635_s3 }
 0x160   :  { %p1256_p9 = pnand %p1254_p8, %p1251_p7 }
 0x162   :  { %1259 = shalt.err (!%p1256_p9)
}
 0x163   :  { %s1295_s24 = smov 128   ;;  %s1296_s25 = smov 8   ;;  %v827_v40 = vmul.f32 %v532_v46, %v532_v46  ;;  %v889_v11 = vadd.f32 %v888_v7, %v826_v5  ;;  %v757_v15 = vadd.f32 %v756_v6, %v532_v46  ;;  %v828_v16 = vmul.f32 %v1358_v49, %v1358_v49 }
 0x164   :  { %948 = dma.vmem_to_hbm [thread:$0]  %s943_s15, 8192, %s1635_s3, [#allocation4], %s1295_s24, %s1295_s24, %s1296_s25   ;;  %v829_v25 = vmul.f32 %v1368_v56, %v1368_v56  ;;  %v830_v26 = vmul.f32 %v1354_v45, %v1354_v45  ;;  %v831_v29 = vmul.f32 %v1363_v53, %v1363_v53  ;;  %v833_v44 = vmul.f32 %v1389_v20, %v1389_v20 }
 0x165   :  { %v758_v17 = vadd.f32 %v757_v15, %v1358_v49  ;;  %v890_v19 = vadd.f32 %v889_v11, %v827_v40  ;;  %v832_v49 = vmul.f32 %v1378_v10, %v1378_v10  ;;  %v837_v63 = vmul.f32 %v1409_v51, %v1409_v51  ;;  %s1297_s3 = smov [#allocation8]  }
 0x166   :  { %v841_v15 = vmul.f32 %v1429_v21, %v1429_v21  ;;  %s955_s28 = sshll.u32 %s1297_s3, 4  ;;  %s956_s28 = int_to_ptr.vmem [resolvable:$true] %s955_s28 }
 0x167   :  { %v891_v22 = vadd.f32 %v890_v19, %v828_v16  ;;  %v759_v23 = vadd.f32 %v758_v17, %v1368_v56  ;;  %s1260_s29 = scalar_lea.vmem %s956_s28, 128  ;;  %p1265_p11 = scmp.lt.s32.totalorder %s956_s28, %s956_s28 }
 0x168   :  { %p1261_p10 = scmp.ne.s32.totalorder %s956_s28, %s1260_s29  ;;  %p1266_p12 = scmp.lt.s32.totalorder %s1260_s29, %s1260_s29 }
 0x169   :  { %v760_v27 = vadd.f32 %v759_v23, %v1354_v45  ;;  %v892_v28 = vadd.f32 %v891_v22, %v829_v25  ;;  %v834_v45 = vmul.f32 %v1374_v4, %v1374_v4 }
 0x16a   :  { %p1267_p13 = por %p1266_p12, %p1265_p11 }
 0x16b   :  { %v893_v33 = vadd.f32 %v892_v28, %v830_v26  ;;  %v761_v35 = vadd.f32 %v760_v27, %v1363_v53  ;;  %v835_v53 = vmul.f32 %v1383_v14, %v1383_v14  ;;  %v845_v27 = vmul.f32 %v1449_v58, %v1449_v58 }
 0x16c   :  { %p1268_p0 = pnand %p1267_p13, %p1261_p10 }
 0x16d   :  { %v762_v36 = vadd.f32 %v761_v35, %v1378_v10  ;;  %v894_v37 = vadd.f32 %v893_v33, %v831_v29  ;;  %v836_v10 = vmul.f32 %v1398_v38, %v1398_v38 }
 0x16f   :  { %v895_v39 = vadd.f32 %v894_v37, %v832_v49  ;;  %v763_v56 = vadd.f32 %v762_v36, %v1389_v20 }
 0x171   :  { %v764_v46 = vadd.f32 %v763_v56, %v1374_v4  ;;  %v896_v47 = vadd.f32 %v895_v39, %v833_v44  ;;  %v838_v4 = vmul.f32 %v1394_v32, %v1394_v32  ;;  %v849_v39 = vmul.f32 %v1469_v30, %v1469_v30 }
 0x173   :  { %v897_v54 = vadd.f32 %v896_v47, %v834_v45  ;;  %v765_v55 = vadd.f32 %v764_v46, %v1383_v14  ;;  %v839_v14 = vmul.f32 %v1403_v43, %v1403_v43 }
 0x175   :  { %v766_v57 = vadd.f32 %v765_v55, %v1398_v38  ;;  %v898_v59 = vadd.f32 %v897_v54, %v835_v53  ;;  %v840_v38 = vmul.f32 %v1418_v8, %v1418_v8  ;;  %v853_v55 = vmul.f32 %v1489_v12, %v1489_v12 }
 0x177   :  { %v899_v60 = vadd.f32 %v898_v59, %v836_v10  ;;  %v767_v20 = vadd.f32 %v766_v57, %v1409_v51 }
 0x179   :  { %v768_v0 = vadd.f32 %v767_v20, %v1394_v32  ;;  %v900_v3 = vadd.f32 %v899_v60, %v837_v63  ;;  %v842_v32 = vmul.f32 %v1414_v1, %v1414_v1 }
 0x17b   :  { %v901_v5 = vadd.f32 %v900_v3, %v838_v4  ;;  %v769_v6 = vadd.f32 %v768_v0, %v1403_v43  ;;  %v843_v43 = vmul.f32 %v1423_v13, %v1423_v13  ;;  %v857_v0 = vmul.f32 %v1509_v62, %v1509_v62 }
 0x17d   :  { %v770_v7 = vadd.f32 %v769_v6, %v1418_v8  ;;  %v902_v40 = vadd.f32 %v901_v5, %v839_v14  ;;  %v844_v8 = vmul.f32 %v1438_v42, %v1438_v42 }
 0x17f   :  { %v903_v11 = vadd.f32 %v902_v40, %v840_v38  ;;  %v771_v51 = vadd.f32 %v770_v7, %v1429_v21 }
 0x181   :  { %v772_v16 = vadd.f32 %v771_v51, %v1414_v1  ;;  %v904_v17 = vadd.f32 %v903_v11, %v841_v15  ;;  %v846_v1 = vmul.f32 %v1434_v34, %v1434_v34  ;;  %v929_v11 = vlaneseq }
 0x183   :  { %v905_v19 = vadd.f32 %v904_v17, %v842_v32  ;;  %v773_v22 = vadd.f32 %v772_v16, %v1423_v13  ;;  %v847_v13 = vmul.f32 %v1443_v48, %v1443_v48  ;;  %v930_v16 = vshrl.u32 %v929_v11, 7 }
 0x185   :  { %v774_v23 = vadd.f32 %v773_v22, %v1438_v42  ;;  %v906_v25 = vadd.f32 %v905_v19, %v843_v43  ;;  %v848_v42 = vmul.f32 %v1458_v18, %v1458_v18  ;;  %vm931_vm0 = vcmp.eq.s32.totalorder %v930_v16, 0 }
 0x186   :  { %vm933_vm1 = vcmp.eq.s32.totalorder %v930_v16, 1 }
 0x187   :  { %v907_v26 = vadd.f32 %v906_v25, %v844_v8  ;;  %v775_v21 = vadd.f32 %v774_v23, %v1449_v58 }
 0x189   :  { %v776_v28 = vadd.f32 %v775_v21, %v1434_v34  ;;  %v908_v29 = vadd.f32 %v907_v26, %v845_v27  ;;  %v850_v34 = vmul.f32 %v1454_v9, %v1454_v9 }
 0x18b   :  { %v909_v33 = vadd.f32 %v908_v29, %v846_v1  ;;  %v777_v35 = vadd.f32 %v776_v28, %v1443_v48  ;;  %v851_v48 = vmul.f32 %v1463_v24, %v1463_v24 }
 0x18d   :  { %v778_v49 = vadd.f32 %v777_v35, %v1458_v18  ;;  %v910_v36 = vadd.f32 %v909_v33, %v847_v13  ;;  %v852_v18 = vmul.f32 %v1478_v61, %v1478_v61 }
 0x18f   :  { %v911_v37 = vadd.f32 %v910_v36, %v848_v42  ;;  %v779_v58 = vadd.f32 %v778_v49, %v1469_v30 }
 0x191   :  { %v780_v56 = vadd.f32 %v779_v58, %v1454_v9  ;;  %v912_v44 = vadd.f32 %v911_v37, %v849_v39  ;;  %v854_v9 = vmul.f32 %v1474_v52, %v1474_v52 }
 0x193   :  { %v913_v45 = vadd.f32 %v912_v44, %v850_v34  ;;  %v781_v46 = vadd.f32 %v780_v56, %v1463_v24  ;;  %v855_v24 = vmul.f32 %v1483_v2, %v1483_v2 }
 0x195   :  { %v782_v47 = vadd.f32 %v781_v46, %v1478_v61  ;;  %v914_v53 = vadd.f32 %v913_v45, %v851_v48  ;;  %v856_v61 = vmul.f32 %v1498_v41, %v1498_v41 }
 0x197   :  { %v915_v54 = vadd.f32 %v914_v53, %v852_v18  ;;  %v783_v30 = vadd.f32 %v782_v47, %v1489_v12 }
 0x199   :  { %v784_v10 = vadd.f32 %v783_v30, %v1474_v52  ;;  %v916_v57 = vadd.f32 %v915_v54, %v853_v55  ;;  %v858_v52 = vmul.f32 %v1494_v31, %v1494_v31 }
 0x19b   :  { %v917_v59 = vadd.f32 %v916_v57, %v854_v9  ;;  %v785_v60 = vadd.f32 %v784_v10, %v1483_v2  ;;  %v859_v2 = vmul.f32 %v1503_v50, %v1503_v50 }
 0x19d   :  { %v786_v20 = vadd.f32 %v785_v60, %v1498_v41  ;;  %v918_v63 = vadd.f32 %v917_v59, %v855_v24 }
 0x19f   :  { %v919_v4 = vadd.f32 %v918_v63, %v856_v61  ;;  %v787_v12 = vadd.f32 %v786_v20, %v1509_v62 }
 0x1a1   :  { %v788_v3 = vadd.f32 %v787_v12, %v1494_v31  ;;  %v920_v14 = vadd.f32 %v919_v4, %v857_v0 }
 0x1a3   :  { %v789_v5 = vadd.f32 %v788_v3, %v1503_v50  ;;  %v921_v6 = vadd.f32 %v920_v14, %v858_v52 }
 0x1a5   :  { %v790_v41 = vrot.slane %v789_v5, 4  ;;  %v922_v38 = vadd.f32 %v921_v6, %v859_v2 }
 0x1a7   :  { %v791_v7 = vadd.f32 %v790_v41, %v789_v5  ;;  %v923_v40 = vrot.slane %v922_v38, 4 }
 0x1a9   :  { %v792_v51 = vrot.slane %v791_v7, 2  ;;  %v924_v15 = vadd.f32 %v923_v40, %v922_v38 }
 0x1ab   :  { %v793_v62 = vadd.f32 %v792_v51, %v791_v7  ;;  %v925_v32 = vrot.slane %v924_v15, 2 }
 0x1ad   :  { %v794_v17 = vrot.slane %v793_v62, 1  ;;  %v926_v43 = vadd.f32 %v925_v32, %v924_v15 }
 0x1af   :  { %v795_v31 = vadd.f32 %v794_v17, %v793_v62  ;;  %v927_v19 = vrot.slane %v926_v43, 1 }
 0x1b1   :  { %v928_v22 = vadd.f32 %v927_v19, %v926_v43  ;;  %v932_v50 = vsel %vm931_vm0, %v795_v31, 0.0 }
 0x1b3   :  { %v934_v8 = vsel %vm933_vm1, %v928_v22, 0.0 }
 0x1b4   :  { %v935_v23 = vadd.f32 %v934_v8, %v932_v50 }
 0x1b6   :  { %936 = vst [vmem:[#allocation8] sm:$0xff] %v935_v23 }
 0x1b7   :  { %1271 = shalt.err (!%p1268_p0)
}
 0x1b8   :  { %s1272_s6 = scalar_lea.hbm %s1636_s4, 128 }
 0x1b9   :  { %p1273_p1 = scmp.ne.s32.totalorder %s1636_s4, %s1272_s6  ;;  %p1276_p2 = scmp.lt.u32.totalorder %s1272_s6, %s1636_s4 }
 0x1bb   :  { %p1278_p3 = pnand %p1276_p2, %p1273_p1 }
 0x1bd   :  { %1281 = shalt.err (!%p1278_p3)
}
 0x1be   :  { %958 = dma.vmem_to_hbm [thread:$0]  %s956_s28, 128, %s1636_s4, [#allocation9]  }
 0x1bf   :  { %1286 = dma.done.wait [#allocation4], 8192  }
 0x1c0   :  { %1287 = vsyncadd [#allocation4], 4294959104 }
 0x1c1   :  { %1288 = dma.done.wait [#allocation9], 128  }
 0x1c2   :  { %1289 = vsyncadd [#allocation9], 4294967168 }
 0x1c3   :  { %965 = vsyncpa [#allocation3], 1 }
 0x1c4   :  { %966 = vsyncpa [#allocation6], 1 }
 0x1c5   :  { %967 = vsyncpa [#allocation4], 1 }
 0x1c6   :  { %968 = vsyncpa [#allocation9], 1 }

</bundles_post_ra>
